<compile_context>
chip_gen: v7x
topology: tpu7x:2x2x1
jax: 0.10.0
libtpu: 0.0.40
codegen_flags: <defaults>
</compile_context>

<pallas_src>
import numpy as np
import jax
import jax.numpy as jnp
from jax import lax
from jax.experimental import pallas as pl
from jax.experimental.pallas import tpu as pltpu

# ---------------------------------------------------------------------------
# db4 filter bank (pywt convention, as used by pytorch_wavelets)
# ---------------------------------------------------------------------------
_L = 8
_DEC_LO = [-0.010597401784997278, 0.032883011666982945, 0.030841381835986965,
           -0.18703481171888114, -0.02798376941698385, 0.6308807679295904,
           0.7148465705525415, 0.23037781330885523]
_DEC_HI = [-0.23037781330885523, 0.7148465705525415, -0.6308807679295904,
           -0.02798376941698385, 0.18703481171888114, 0.030841381835986965,
           -0.032883011666982945, -0.010597401784997278]
_REC_LO = [0.23037781330885523, 0.7148465705525415, 0.6308807679295904,
           -0.02798376941698385, -0.18703481171888114, 0.030841381835986965,
           0.032883011666982945, -0.010597401784997278]
_REC_HI = [-0.010597401784997278, -0.032883011666982945, 0.030841381835986965,
           0.18703481171888114, -0.02798376941698385, -0.6308807679295904,
           0.7148465705525415, -0.23037781330885523]


# ---------------------------------------------------------------------------
# DWT / IDWT (db4, 'symmetric') — plain-JAX glue via depthwise convolutions
# ---------------------------------------------------------------------------
def _afb1d(x, axis):
    """Analysis filter bank along `axis`: stride-2 depthwise conv, symmetric ext."""
    c = x.shape[1]
    ax = axis % 4
    n = x.shape[ax]
    outsize = (n + _L - 1) // 2                       # pywt dwt_coeff_len
    p = 2 * (outsize - 1) - n + _L
    pad = [(0, 0)] * 4
    pad[ax] = (p // 2, (p + 1) // 2)
    xp = jnp.pad(x, pad, mode="symmetric")
    filt = jnp.stack([jnp.asarray(_DEC_LO[::-1], x.dtype),
                      jnp.asarray(_DEC_HI[::-1], x.dtype)], axis=0)   # (2, L)
    if ax == 3:                                       # width
        rhs = jnp.tile(filt[:, None, None, :], (c, 1, 1, 1))          # (2C,1,1,L)
        strides = (1, 2)
    else:                                             # height
        rhs = jnp.tile(filt[:, None, :, None], (c, 1, 1, 1))          # (2C,1,L,1)
        strides = (2, 1)
    out = lax.conv_general_dilated(
        xp, rhs, window_strides=strides, padding="VALID",
        feature_group_count=c, dimension_numbers=("NCHW", "OIHW", "NCHW"))
    return out[:, 0::2], out[:, 1::2]                 # (lo, hi)


def _sfb1d(lo, hi, axis):
    """Synthesis filter bank along `axis`: transposed conv, stride 2, pad L-2."""
    c = lo.shape[1]
    ax = axis % 4
    rec_lo = jnp.asarray(_REC_LO[::-1], lo.dtype)
    rec_hi = jnp.asarray(_REC_HI[::-1], lo.dtype)
    if ax == 3:                                       # width
        rhs_lo = jnp.tile(rec_lo[None, None, None, :], (c, 1, 1, 1))
        rhs_hi = jnp.tile(rec_hi[None, None, None, :], (c, 1, 1, 1))
        dil = (1, 2); pad = [(0, 0), (1, 1)]
    else:                                             # height
        rhs_lo = jnp.tile(rec_lo[None, None, :, None], (c, 1, 1, 1))
        rhs_hi = jnp.tile(rec_hi[None, None, :, None], (c, 1, 1, 1))
        dil = (2, 1); pad = [(1, 1), (0, 0)]

    def conv(v, rhs):
        return lax.conv_general_dilated(
            v, rhs, window_strides=(1, 1), padding=pad, lhs_dilation=dil,
            feature_group_count=c, dimension_numbers=("NCHW", "OIHW", "NCHW"))

    return conv(lo, rhs_lo) + conv(hi, rhs_hi)


def dwt2d(x, level):
    """Returns (yl, [yh_1 ... yh_J]) like pytorch_wavelets.DWTForward."""
    ll = x
    yh = []
    for _ in range(level):
        lo_w, hi_w = _afb1d(ll, axis=-1)              # along width
        ll_n, lh = _afb1d(lo_w, axis=-2)              # along height
        hl, hh = _afb1d(hi_w, axis=-2)
        ll = ll_n
        yh.append(jnp.stack([lh, hl, hh], axis=2))
    return ll, yh


def idwt2d(yl, yh):
    ll = yl
    for h in yh[::-1]:
        if ll.shape[-2] > h.shape[-2]:
            ll = ll[..., :-1, :]
        if ll.shape[-1] > h.shape[-1]:
            ll = ll[..., :-1]
        lh, hl, hh = h[:, :, 0], h[:, :, 1], h[:, :, 2]
        lo = _sfb1d(ll, lh, axis=-2)
        hi = _sfb1d(hl, hh, axis=-2)
        ll = _sfb1d(lo, hi, axis=-1)
    return ll


# ---------------------------------------------------------------------------
# Pallas kernel: per-position channel mixing
#   out[b, o, s] = sum_i x[b, i, s] * w[i, o, s]
# Grid = (S tiles ["parallel"], Ci tiles ["arbitrary" reduction]).
# ---------------------------------------------------------------------------
_LANE = 128
_SUBLANE = 8


def _mix_kernel_inplace(x_ref, w_ref, o_ref):
    """f32 output: accumulate directly into the (resident) output block."""
    # x_ref: (B, t_ci, t_s)   w_ref: (t_ci, Co, t_s)   o_ref: (B, Co, t_s) f32
    t_ci = x_ref.shape[1]
    acc = jnp.zeros(o_ref.shape, jnp.float32)
    for i in range(t_ci):                       # bounded static unroll (<= 32)
        xi = x_ref[:, i, :].astype(jnp.float32)       # (B, t_s)  static sublane slice
        wi = w_ref[i].astype(jnp.float32)             # (Co, t_s)
        acc = acc + xi[:, None, :] * wi[None, :, :]

    @pl.when(pl.program_id(1) == 0)
    def _first():
        o_ref[...] = acc

    @pl.when(pl.program_id(1) != 0)
    def _rest():
        o_ref[...] = o_ref[...] + acc


def _mix_kernel_scratch(x_ref, w_ref, o_ref, acc_ref):
    """Narrow output dtypes: f32 VMEM scratch accumulator + finalize cast."""
    @pl.when(pl.program_id(1) == 0)
    def _init():
        acc_ref[...] = jnp.zeros_like(acc_ref)

    t_ci = x_ref.shape[1]
    acc = acc_ref[...]
    for i in range(t_ci):
        xi = x_ref[:, i, :].astype(jnp.float32)
        wi = w_ref[i].astype(jnp.float32)
        acc = acc + xi[:, None, :] * wi[None, :, :]
    acc_ref[...] = acc

    @pl.when(pl.program_id(1) == pl.num_programs(1) - 1)
    def _finalize():
        o_ref[...] = acc_ref[...].astype(o_ref.dtype)


def _round_up(v, m):
    return (v + m - 1) // m * m


def _default_vmem_budget_bytes():
    """Per-chip tile budget: ~1/4 of physical VMEM, capped at 24 MiB.

    v5e/v6e (128 MiB) -> 24 MiB; v7x (64 MiB / TC) -> 16 MiB, preserving
    double-buffered DMA/compute overlap on the smaller VMEM.
    """
    try:
        cap = int(pltpu.get_tpu_info().vmem_capacity_bytes)
    except Exception:
        cap = 64 * 1024 * 1024
    return max(8 * 1024 * 1024, min(24 * 1024 * 1024, cap // 4))


def mul2d_channel_mix(x_bands, w_bands, out_dtype, *, max_tile_s=2048,
                      max_tile_ci=32, vmem_budget_bytes=None):
    """x_bands: (B, Ci, S), w_bands: (Ci, Co, S) -> (B, Co, S).

    S (folded band*spatial axis) is zero-padded to the lane tile so every store
    is a full-width vst; Ci and Co are zero-padded to sublane multiples (zeros
    contribute nothing to the reduction / are sliced off the output).
    """
    b, ci, s = map(int, x_bands.shape)
    co = int(w_bands.shape[1])
    if vmem_budget_bytes is None:
        vmem_budget_bytes = _default_vmem_budget_bytes()

    out_dtype = np.dtype(out_dtype)
    use_scratch = out_dtype != np.float32

    # Channel tile (sublane axis of the x block): whole padded Ci when small.
    ci8 = _round_up(ci, _SUBLANE)
    t_ci = min(ci8, _round_up(max_tile_ci, _SUBLANE))
    ci_pad = _round_up(ci8, t_ci)
    co8 = _round_up(co, _SUBLANE)                 # sublane-dense w / out blocks

    bx = np.dtype(x_bands.dtype).itemsize
    bw = np.dtype(w_bands.dtype).itemsize
    bo = out_dtype.itemsize
    # Bytes per lane of the S tile: double-buffered x / w / out blocks (+ scratch).
    per_lane = 2 * (b * t_ci * bx + t_ci * co8 * bw + b * co8 * bo)
    if use_scratch:
        per_lane += b * co8 * 4

    # Lane tile: multiple of 128 that (a) fits the VMEM budget, (b) minimizes S
    # padding, (c) keeps >= 2 S tiles when possible (v7x 2-TC megacore sharding).
    s128 = _round_up(s, _LANE)
    n128 = s128 // _LANE
    k_cap = max(1, min(max_tile_s // _LANE,
                       int(vmem_budget_bytes) // (per_lane * _LANE)))
    best_k, best_waste = 1, None
    for k in range(1, min(k_cap, n128) + 1):
        tiles = -(-n128 // k)
        if n128 >= 2 and tiles < 2:
            continue
        waste = tiles * k - n128
        if best_waste is None or waste <= best_waste:     # ties -> larger tile
            best_k, best_waste = k, waste
    t_s = best_k * _LANE
    s_pad = _round_up(s128, t_s)

    xp = jnp.pad(x_bands, ((0, 0), (0, ci_pad - ci), (0, s_pad - s)))
    wp = jnp.pad(w_bands, ((0, ci_pad - ci), (0, co8 - co), (0, s_pad - s)))

    grid = (s_pad // t_s, ci_pad // t_ci)

    vmem_needed = per_lane * t_s
    vmem_limit = int(max(vmem_needed + vmem_needed // 4 + (2 << 20), 32 << 20))

    cost = pl.CostEstimate(
        flops=2 * b * ci * co * s,
        transcendentals=0,
        bytes_accessed=int(xp.size) * bx + int(wp.size) * bw
                       + b * co8 * s_pad * bo)

    common = dict(
        out_shape=jax.ShapeDtypeStruct((b, co8, s_pad), out_dtype),
        grid=grid,
        in_specs=[
            pl.BlockSpec((b, t_ci, t_s), lambda si, ki: (0, ki, si)),
            pl.BlockSpec((t_ci, co8, t_s), lambda si, ki: (ki, 0, si)),
        ],
        out_specs=pl.BlockSpec((b, co8, t_s), lambda si, ki: (0, 0, si)),
        compiler_params=pltpu.CompilerParams(
            dimension_semantics=("parallel", "arbitrary"),
            vmem_limit_bytes=vmem_limit),
        cost_estimate=cost,
    )
    if use_scratch:
        out = pl.pallas_call(
            _mix_kernel_scratch,
            scratch_shapes=[pltpu.VMEM((b, co8, t_s), jnp.float32)],
            **common)(xp, wp)
    else:
        out = pl.pallas_call(_mix_kernel_inplace, **common)(xp, wp)
    return out[:, :co, :s]


# ---------------------------------------------------------------------------
# WaveConv2d module (forward pass)
# ---------------------------------------------------------------------------
class WaveConv2d:
    def __init__(self, in_channels, out_channels, level, dummy, key,
                 weight_dtype=jnp.float32):
        self.in_channels = in_channels
        self.out_channels = out_channels
        self.level = level
        mode_data, _ = dwt2d(dummy, level)
        self.modes1 = int(mode_data.shape[-2])
        self.modes2 = int(mode_data.shape[-1])
        scale = 1.0 / (in_channels * out_channels)
        shape = (in_channels, out_channels, self.modes1, self.modes2)
        ks = jax.random.split(key, 4)
        s = self.modes1 * self.modes2
        # Canonical parameter: the 4 band weights folded onto one flattened axis
        # (Ci, Co, 4*m1*m2).  weights1..4 below are derived views of this tensor,
        # so there is no stale per-band snapshot to fall out of sync.  Storing in
        # bf16 (weight_dtype=jnp.bfloat16) halves the HBM weight stream; the
        # kernel always accumulates in f32.
        self.weights_folded = jnp.concatenate(
            [(scale * jax.random.uniform(k, shape, jnp.float32))
             .astype(weight_dtype).reshape(in_channels, out_channels, s)
             for k in ks], axis=-1)

    def _band_weight(self, band):
        s = self.modes1 * self.modes2
        return self.weights_folded[:, :, band * s:(band + 1) * s].reshape(
            self.in_channels, self.out_channels, self.modes1, self.modes2)

    @property
    def weights1(self):
        return self._band_weight(0)

    @property
    def weights2(self):
        return self._band_weight(1)

    @property
    def weights3(self):
        return self._band_weight(2)

    @property
    def weights4(self):
        return self._band_weight(3)

    def __call__(self, x):
        b = x.shape[0]
        ci, co = self.in_channels, self.out_channels
        m1, m2 = self.modes1, self.modes2
        s = m1 * m2

        x_ft, x_coeff = dwt2d(x, self.level)          # DWT
        coarse = x_coeff[-1]                          # (B, Ci, 3, m1, m2)

        # Fold approx + 3 coarsest detail bands onto one flattened lane axis,
        # keeping the natural (B, Ci, 4*S) layout (no HBM transpose).
        x_bands = jnp.concatenate(
            [x_ft.reshape(b, ci, s),
             coarse[:, :, 0].reshape(b, ci, s),
             coarse[:, :, 1].reshape(b, ci, s),
             coarse[:, :, 2].reshape(b, ci, s)], axis=-1)

        out = mul2d_channel_mix(x_bands, self.weights_folded, x.dtype)  # (B,Co,4S)

        out_ft = out[:, :, 0 * s:1 * s].reshape(b, co, m1, m2)
        new_coarse = jnp.stack(
            [out[:, :, 1 * s:2 * s].reshape(b, co, m1, m2),
             out[:, :, 2 * s:3 * s].reshape(b, co, m1, m2),
             out[:, :, 3 * s:4 * s].reshape(b, co, m1, m2)], axis=2)
        x_coeff = list(x_coeff)
        x_coeff[-1] = new_coarse
        return idwt2d(out_ft, x_coeff)                # IDWT


# ---------------------------------------------------------------------------
def _reference_forward(layer, x):
    """Pure-JAX reference (einsum channel mixing) for cross-checking."""
    hi = jax.lax.Precision.HIGHEST
    x_ft, x_coeff = dwt2d(x, layer.level)
    out_ft = jnp.einsum("bixy,ioxy->boxy", x_ft, layer.weights1, precision=hi)
    coarse = x_coeff[-1]
    new_coarse = jnp.stack(
        [jnp.einsum("bixy,ioxy->boxy", coarse[:, :, 0], layer.weights2, precision=hi),
         jnp.einsum("bixy,ioxy->boxy", coarse[:, :, 1], layer.weights3, precision=hi),
         jnp.einsum("bixy,ioxy->boxy", coarse[:, :, 2], layer.weights4, precision=hi)],
        axis=2)
    x_coeff = list(x_coeff)
    x_coeff[-1] = new_coarse
    return idwt2d(out_ft, x_coeff)


if __name__ == "__main__":
    key = jax.random.PRNGKey(0)
    B, C, H, W = 2, 4, 16, 16
    # Reference file uses level=5 on large ERA5 grids; with a 16x16 demo grid we
    # use level=2 so the coarsest wavelet coefficients (modes) stay well-defined.
    LEVEL = 2
    kx, kw = jax.random.split(key)
    x = jax.random.normal(kx, (B, C, H, W), jnp.float32)
    dummy = jnp.zeros((1, C, H, W), jnp.float32)

    # f32 weights: exact match against the einsum reference.
    layer = WaveConv2d(C, C, LEVEL, dummy, kw)
    y = jax.block_until_ready(jax.jit(layer.__call__)(x))
    assert y.shape == (B, C, H, W), y.shape
    y_ref = _reference_forward(layer, x)
    max_err = float(np.max(np.abs(np.asarray(y_ref) - np.asarray(y))))
    assert np.allclose(np.asarray(y_ref), np.asarray(y), rtol=1e-5, atol=1e-5), max_err

    # bf16 weight storage (HBM-traffic optimization); accumulation stays f32.
    layer16 = WaveConv2d(C, C, LEVEL, dummy, kw, weight_dtype=jnp.bfloat16)
    y16 = jax.block_until_ready(jax.jit(layer16.__call__)(x))
    y16_ref = _reference_forward(layer16, x)
    assert np.allclose(np.asarray(y16_ref), np.asarray(y16), rtol=1e-3, atol=1e-3)

    print("KERNEL_OK")
</pallas_src>

<mosaic_0001>
module attributes {stable_mosaic.version = 11 : i64} {
  func.func @_mix_kernel_inplace(%arg0: i32, %arg1: i32, %arg2: memref<2x8x128xf32, #tpu.memory_space<vmem>>, %arg3: memref<8x8x128xf32, #tpu.memory_space<vmem>>, %arg4: memref<2x8x128xf32, #tpu.memory_space<vmem>>) attributes {dimension_semantics = [#tpu.dimension_semantics<parallel>, #tpu.dimension_semantics<arbitrary>], iteration_bounds = array<i64: 3, 1>, scalar_prefetch = 0 : i64, scratch_operands = 0 : i64, tpu.core_type = #tpu.core_type<tc>, window_params = [{transform_indices = @transform_0, window_bounds = array<i64: 2, 8, 128>}, {transform_indices = @transform_1, window_bounds = array<i64: 8, 8, 128>}, {transform_indices = @transform_2, window_bounds = array<i64: 2, 8, 128>}]} {
    %cst = arith.constant 0.000000e+00 : f32
    %0 = vector.broadcast %cst : f32 to vector<2x8x128xf32>
    %c0 = arith.constant 0 : index
    %c0_0 = arith.constant 0 : index
    %c0_1 = arith.constant 0 : index
    %1 = vector.load %arg2[%c0, %c0_0, %c0_1] : memref<2x8x128xf32, #tpu.memory_space<vmem>>, vector<2x1x128xf32>
    %2 = vector.shape_cast %1 : vector<2x1x128xf32> to vector<2x128xf32>
    %c0_2 = arith.constant 0 : index
    %c0_3 = arith.constant 0 : index
    %c0_4 = arith.constant 0 : index
    %3 = vector.load %arg3[%c0_2, %c0_3, %c0_4] : memref<8x8x128xf32, #tpu.memory_space<vmem>>, vector<1x8x128xf32>
    %4 = vector.shape_cast %3 : vector<1x8x128xf32> to vector<8x128xf32>
    %5 = vector.shape_cast %2 : vector<2x128xf32> to vector<2x1x128xf32>
    %6 = vector.shape_cast %4 : vector<8x128xf32> to vector<1x8x128xf32>
    %7 = vector.broadcast %5 : vector<2x1x128xf32> to vector<2x8x128xf32>
    %8 = vector.broadcast %6 : vector<1x8x128xf32> to vector<2x8x128xf32>
    %9 = arith.mulf %7, %8 : vector<2x8x128xf32>
    %10 = arith.addf %0, %9 : vector<2x8x128xf32>
    %c0_5 = arith.constant 0 : index
    %c1 = arith.constant 1 : index
    %c0_6 = arith.constant 0 : index
    %11 = vector.load %arg2[%c0_5, %c1, %c0_6] : memref<2x8x128xf32, #tpu.memory_space<vmem>>, vector<2x1x128xf32>
    %12 = vector.shape_cast %11 : vector<2x1x128xf32> to vector<2x128xf32>
    %c1_7 = arith.constant 1 : index
    %c0_8 = arith.constant 0 : index
    %c0_9 = arith.constant 0 : index
    %13 = vector.load %arg3[%c1_7, %c0_8, %c0_9] : memref<8x8x128xf32, #tpu.memory_space<vmem>>, vector<1x8x128xf32>
    %14 = vector.shape_cast %13 : vector<1x8x128xf32> to vector<8x128xf32>
    %15 = vector.shape_cast %12 : vector<2x128xf32> to vector<2x1x128xf32>
    %16 = vector.shape_cast %14 : vector<8x128xf32> to vector<1x8x128xf32>
    %17 = vector.broadcast %15 : vector<2x1x128xf32> to vector<2x8x128xf32>
    %18 = vector.broadcast %16 : vector<1x8x128xf32> to vector<2x8x128xf32>
    %19 = arith.mulf %17, %18 : vector<2x8x128xf32>
    %20 = arith.addf %10, %19 : vector<2x8x128xf32>
    %c0_10 = arith.constant 0 : index
    %c2 = arith.constant 2 : index
    %c0_11 = arith.constant 0 : index
    %21 = vector.load %arg2[%c0_10, %c2, %c0_11] : memref<2x8x128xf32, #tpu.memory_space<vmem>>, vector<2x1x128xf32>
    %22 = vector.shape_cast %21 : vector<2x1x128xf32> to vector<2x128xf32>
    %c2_12 = arith.constant 2 : index
    %c0_13 = arith.constant 0 : index
    %c0_14 = arith.constant 0 : index
    %23 = vector.load %arg3[%c2_12, %c0_13, %c0_14] : memref<8x8x128xf32, #tpu.memory_space<vmem>>, vector<1x8x128xf32>
    %24 = vector.shape_cast %23 : vector<1x8x128xf32> to vector<8x128xf32>
    %25 = vector.shape_cast %22 : vector<2x128xf32> to vector<2x1x128xf32>
    %26 = vector.shape_cast %24 : vector<8x128xf32> to vector<1x8x128xf32>
    %27 = vector.broadcast %25 : vector<2x1x128xf32> to vector<2x8x128xf32>
    %28 = vector.broadcast %26 : vector<1x8x128xf32> to vector<2x8x128xf32>
    %29 = arith.mulf %27, %28 : vector<2x8x128xf32>
    %30 = arith.addf %20, %29 : vector<2x8x128xf32>
    %c0_15 = arith.constant 0 : index
    %c3 = arith.constant 3 : index
    %c0_16 = arith.constant 0 : index
    %31 = vector.load %arg2[%c0_15, %c3, %c0_16] : memref<2x8x128xf32, #tpu.memory_space<vmem>>, vector<2x1x128xf32>
    %32 = vector.shape_cast %31 : vector<2x1x128xf32> to vector<2x128xf32>
    %c3_17 = arith.constant 3 : index
    %c0_18 = arith.constant 0 : index
    %c0_19 = arith.constant 0 : index
    %33 = vector.load %arg3[%c3_17, %c0_18, %c0_19] : memref<8x8x128xf32, #tpu.memory_space<vmem>>, vector<1x8x128xf32>
    %34 = vector.shape_cast %33 : vector<1x8x128xf32> to vector<8x128xf32>
    %35 = vector.shape_cast %32 : vector<2x128xf32> to vector<2x1x128xf32>
    %36 = vector.shape_cast %34 : vector<8x128xf32> to vector<1x8x128xf32>
    %37 = vector.broadcast %35 : vector<2x1x128xf32> to vector<2x8x128xf32>
    %38 = vector.broadcast %36 : vector<1x8x128xf32> to vector<2x8x128xf32>
    %39 = arith.mulf %37, %38 : vector<2x8x128xf32>
    %40 = arith.addf %30, %39 : vector<2x8x128xf32>
    %c0_20 = arith.constant 0 : index
    %c4 = arith.constant 4 : index
    %c0_21 = arith.constant 0 : index
    %41 = vector.load %arg2[%c0_20, %c4, %c0_21] : memref<2x8x128xf32, #tpu.memory_space<vmem>>, vector<2x1x128xf32>
    %42 = vector.shape_cast %41 : vector<2x1x128xf32> to vector<2x128xf32>
    %c4_22 = arith.constant 4 : index
    %c0_23 = arith.constant 0 : index
    %c0_24 = arith.constant 0 : index
    %43 = vector.load %arg3[%c4_22, %c0_23, %c0_24] : memref<8x8x128xf32, #tpu.memory_space<vmem>>, vector<1x8x128xf32>
    %44 = vector.shape_cast %43 : vector<1x8x128xf32> to vector<8x128xf32>
    %45 = vector.shape_cast %42 : vector<2x128xf32> to vector<2x1x128xf32>
    %46 = vector.shape_cast %44 : vector<8x128xf32> to vector<1x8x128xf32>
    %47 = vector.broadcast %45 : vector<2x1x128xf32> to vector<2x8x128xf32>
    %48 = vector.broadcast %46 : vector<1x8x128xf32> to vector<2x8x128xf32>
    %49 = arith.mulf %47, %48 : vector<2x8x128xf32>
    %50 = arith.addf %40, %49 : vector<2x8x128xf32>
    %c0_25 = arith.constant 0 : index
    %c5 = arith.constant 5 : index
    %c0_26 = arith.constant 0 : index
    %51 = vector.load %arg2[%c0_25, %c5, %c0_26] : memref<2x8x128xf32, #tpu.memory_space<vmem>>, vector<2x1x128xf32>
    %52 = vector.shape_cast %51 : vector<2x1x128xf32> to vector<2x128xf32>
    %c5_27 = arith.constant 5 : index
    %c0_28 = arith.constant 0 : index
    %c0_29 = arith.constant 0 : index
    %53 = vector.load %arg3[%c5_27, %c0_28, %c0_29] : memref<8x8x128xf32, #tpu.memory_space<vmem>>, vector<1x8x128xf32>
    %54 = vector.shape_cast %53 : vector<1x8x128xf32> to vector<8x128xf32>
    %55 = vector.shape_cast %52 : vector<2x128xf32> to vector<2x1x128xf32>
    %56 = vector.shape_cast %54 : vector<8x128xf32> to vector<1x8x128xf32>
    %57 = vector.broadcast %55 : vector<2x1x128xf32> to vector<2x8x128xf32>
    %58 = vector.broadcast %56 : vector<1x8x128xf32> to vector<2x8x128xf32>
    %59 = arith.mulf %57, %58 : vector<2x8x128xf32>
    %60 = arith.addf %50, %59 : vector<2x8x128xf32>
    %c0_30 = arith.constant 0 : index
    %c6 = arith.constant 6 : index
    %c0_31 = arith.constant 0 : index
    %61 = vector.load %arg2[%c0_30, %c6, %c0_31] : memref<2x8x128xf32, #tpu.memory_space<vmem>>, vector<2x1x128xf32>
    %62 = vector.shape_cast %61 : vector<2x1x128xf32> to vector<2x128xf32>
    %c6_32 = arith.constant 6 : index
    %c0_33 = arith.constant 0 : index
    %c0_34 = arith.constant 0 : index
    %63 = vector.load %arg3[%c6_32, %c0_33, %c0_34] : memref<8x8x128xf32, #tpu.memory_space<vmem>>, vector<1x8x128xf32>
    %64 = vector.shape_cast %63 : vector<1x8x128xf32> to vector<8x128xf32>
    %65 = vector.shape_cast %62 : vector<2x128xf32> to vector<2x1x128xf32>
    %66 = vector.shape_cast %64 : vector<8x128xf32> to vector<1x8x128xf32>
    %67 = vector.broadcast %65 : vector<2x1x128xf32> to vector<2x8x128xf32>
    %68 = vector.broadcast %66 : vector<1x8x128xf32> to vector<2x8x128xf32>
    %69 = arith.mulf %67, %68 : vector<2x8x128xf32>
    %70 = arith.addf %60, %69 : vector<2x8x128xf32>
    %c0_35 = arith.constant 0 : index
    %c7 = arith.constant 7 : index
    %c0_36 = arith.constant 0 : index
    %71 = vector.load %arg2[%c0_35, %c7, %c0_36] : memref<2x8x128xf32, #tpu.memory_space<vmem>>, vector<2x1x128xf32>
    %72 = vector.shape_cast %71 : vector<2x1x128xf32> to vector<2x128xf32>
    %c7_37 = arith.constant 7 : index
    %c0_38 = arith.constant 0 : index
    %c0_39 = arith.constant 0 : index
    %73 = vector.load %arg3[%c7_37, %c0_38, %c0_39] : memref<8x8x128xf32, #tpu.memory_space<vmem>>, vector<1x8x128xf32>
    %74 = vector.shape_cast %73 : vector<1x8x128xf32> to vector<8x128xf32>
    %75 = vector.shape_cast %72 : vector<2x128xf32> to vector<2x1x128xf32>
    %76 = vector.shape_cast %74 : vector<8x128xf32> to vector<1x8x128xf32>
    %77 = vector.broadcast %75 : vector<2x1x128xf32> to vector<2x8x128xf32>
    %78 = vector.broadcast %76 : vector<1x8x128xf32> to vector<2x8x128xf32>
    %79 = arith.mulf %77, %78 : vector<2x8x128xf32>
    %80 = arith.addf %70, %79 : vector<2x8x128xf32>
    %c0_i32 = arith.constant 0 : i32
    %81 = arith.cmpi eq, %arg1, %c0_i32 : i32
    %82 = arith.extui %81 : i1 to i32
    %c0_i32_40 = arith.constant 0 : i32
    %83 = arith.cmpi ne, %82, %c0_i32_40 : i32
    scf.if %83 {
      %c0_43 = arith.constant 0 : index
      %c0_44 = arith.constant 0 : index
      %c0_45 = arith.constant 0 : index
      %87 = vector.load %arg4[%c0_43, %c0_44, %c0_45] : memref<2x8x128xf32, #tpu.memory_space<vmem>>, vector<2x8x128xf32>
      tpu.vector_store %arg4[%c0_43, %c0_44, %c0_45], %80 {strides = array<i32>} : memref<2x8x128xf32, #tpu.memory_space<vmem>>, vector<2x8x128xf32>,
    } else {
    }
    %c0_i32_41 = arith.constant 0 : i32
    %84 = arith.cmpi ne, %arg1, %c0_i32_41 : i32
    %85 = arith.extui %84 : i1 to i32
    %c0_i32_42 = arith.constant 0 : i32
    %86 = arith.cmpi ne, %85, %c0_i32_42 : i32
    scf.if %86 {
      %c0_43 = arith.constant 0 : index
      %c0_44 = arith.constant 0 : index
      %c0_45 = arith.constant 0 : index
      %87 = vector.load %arg4[%c0_43, %c0_44, %c0_45] : memref<2x8x128xf32, #tpu.memory_space<vmem>>, vector<2x8x128xf32>
      %88 = arith.addf %87, %80 : vector<2x8x128xf32>
      %c0_46 = arith.constant 0 : index
      %c0_47 = arith.constant 0 : index
      %c0_48 = arith.constant 0 : index
      %89 = vector.load %arg4[%c0_46, %c0_47, %c0_48] : memref<2x8x128xf32, #tpu.memory_space<vmem>>, vector<2x8x128xf32>
      tpu.vector_store %arg4[%c0_46, %c0_47, %c0_48], %88 {strides = array<i32>} : memref<2x8x128xf32, #tpu.memory_space<vmem>>, vector<2x8x128xf32>,
    } else {
    }
    return
  }
  func.func @transform_0(%arg0: i32, %arg1: i32) -> (i32, i32, i32) {
    %c0_i32 = arith.constant 0 : i32
    %c0_i32_0 = arith.constant 0 : i32
    return %c0_i32, %arg1, %arg0 : i32, i32, i32
  }
  func.func @transform_1(%arg0: i32, %arg1: i32) -> (i32, i32, i32) {
    %c0_i32 = arith.constant 0 : i32
    %c0_i32_0 = arith.constant 0 : i32
    return %arg1, %c0_i32, %arg0 : i32, i32, i32
  }
  func.func @transform_2(%arg0: i32, %arg1: i32) -> (i32, i32, i32) {
    %c0_i32 = arith.constant 0 : i32
    %c0_i32_0 = arith.constant 0 : i32
    %c0_i32_1 = arith.constant 0 : i32
    return %c0_i32, %c0_i32_0, %arg0 : i32, i32, i32
  }
}

</mosaic_0001>

<bundles_post_ra>
// kernel: a_call__.1
= control target key start
LH: loop header
LB: loop body
LE: loop exit
PB: predicated region body
PF: predicated region fallthrough
CT: control target
= control target key end

     0   :  { %s689_s9 = smov 0   ;;  %s691_s10 = smov 0   ;;  %s806_s0 = inlined_call_operand.vmem [shape: f32[2,8,384], index: 0, kind: input, shape index: {}]   ;;  %s807_s1 = inlined_call_operand.vmem [shape: f32[8,8,384], index: 1, kind: input, shape index: {}]   ;;  %s808_s2 = inlined_call_operand.vmem [shape: f32[2,8,384], index: 2, kind: output, shape index: {}]  }
   0x1   :  { %s693_s11 = smov 0   ;;  %s695_s12 = smov 0  }
   0x2   :  { %s697_s13 = smov 0  }
   0x3 LB: > { %s24_s14 = sadd.s32 1, %s668_s12  ;;  %s555_s15 = sadd.s32 4294967295, %s672_s13   ;;  %s672_s13 = sphi %s697_s13, %s12_s13   ;;  %s668_s12 = sphi %s695_s12, %s814_s12   ;;  %s664_s11 = sphi %s693_s11, %s813_s11   ;;  %s660_s10 = sphi %s691_s10, %s812_s10   ;;  %s656_s9 = sphi %s689_s9, %s811_s9  }
   0x4   : > { %p26_p0 = scmp.ge.s32.totalorder %s24_s14, 3  ;;  %p40_p1 = scmp.ne.s32.totalorder %s660_s10, %s656_s9 }
   0x5   : > { %p41_p2 = scmp.eq.s32.totalorder %s672_s13, 0  ;;  %p98_p4 = scmp.eq.s32.totalorder %s555_s15, 2 }
   0x6   : > { %s816_s14 = smov (%p26_p0, %s24_s14), 0  ;;  %s33_s18 = sadd.s32 1, %s660_s10 }
   0x7   : > { %p721_p3 = por %p41_p2, %p40_p1  ;;  %s29_s17 = ssub.s32 %s668_s12, %s816_s14 }
   0x8   : > { %p31_p5 = scmp.eq.s32.totalorder %s29_s17, 0  ;;  %p728_p6 = por %p98_p4, %p40_p1 }
   0x9   : > { %p558_p7 = scmp.ge.s32.totalorder %s672_s13, 3 }
   0xa   : > { %s733_s20 = scalar_select %p31_p5, %s660_s10, %s33_s18  }
   0xb   : > { %120 = sbr.rel (%p558_p7) target bundleno = 33 (0x21), region = 16 }
  0x12   : > { %123 = sbr.rel (!%p721_p3) target bundleno = 25 (0x19), region = 20  ;;  %s125_s21 = sand.u32 (%p721_p3), 1, %s660_s10  }
  0x13   : > { %s560_s22 = sshll.u32 (%p721_p3), %s668_s12, 3  ;;  %s559_s23 = sshll.u32 (%p721_p3), %s125_s21, 4 }
  0x14   : > { %s131_s26 = scalar_lea.vmem (%p721_p3), %s806_s0, %s560_s22  ;;  %s127_s27 = scalar_lea.vmem (%p721_p3), [#allocation2], %s559_s23 }
  0x15   : > { %v161_v0 = vld [vmem:[%s131_s26] sm:$0xff] (%p721_p3)  ;;  %v163_v1 = vld [vmem:[%s131_s26 + $0x18] sm:$0xff] (%p721_p3) }
  0x16   : > { %162 = vst [vmem:[%s127_s27] sm:$0xff] (%p721_p3), %v161_v0  ;;  %164 = vst [vmem:[%s127_s27 + $0x8] sm:$0xff] (%p721_p3), %v163_v1 }
  0x19 PF: > { %170 = sbr.rel (!%p721_p3) target bundleno = 33 (0x21), region = 58  ;;  %s172_s28 = sand.u32 (%p721_p3), 1, %s660_s10  }
  0x1a   : > { %s562_s29 = sshll.u32 (%p721_p3), %s668_s12, 3  ;;  %s561_s30 = sshll.u32 (%p721_p3), %s172_s28, 6 }
  0x1b   : > { %s179_s5 = scalar_lea.vmem (%p721_p3), %s807_s1, %s562_s29  ;;  %s174_s6 = scalar_lea.vmem (%p721_p3), [#allocation3], %s561_s30 }
  0x1c   : > { %v221_v2 = vld [vmem:[%s179_s5] sm:$0xff] (%p721_p3)  ;;  %v223_v3 = vld [vmem:[%s179_s5 + $0x18] sm:$0xff] (%p721_p3)  ;;  %v225_v4 = vld [vmem:[%s179_s5 + $0x30] sm:$0xff] (%p721_p3) }
  0x1d   : > { %222 = vst [vmem:[%s174_s6] sm:$0xff] (%p721_p3), %v221_v2  ;;  %224 = vst [vmem:[%s174_s6 + $0x8] sm:$0xff] (%p721_p3), %v223_v3  ;;  %v227_v5 = vld [vmem:[%s179_s5 + $0x48] sm:$0xff] (%p721_p3)  ;;  %v229_v6 = vld [vmem:[%s179_s5 + $0x60] sm:$0xff] (%p721_p3) }
  0x1e   : > { %226 = vst [vmem:[%s174_s6 + $0x10] sm:$0xff] (%p721_p3), %v225_v4  ;;  %v231_v7 = vld [vmem:[%s179_s5 + $0x78] sm:$0xff] (%p721_p3)  ;;  %228 = vst [vmem:[%s174_s6 + $0x18] sm:$0xff] (%p721_p3), %v227_v5  ;;  %v233_v8 = vld [vmem:[%s179_s5 + $0x90] sm:$0xff] (%p721_p3) }
  0x1f   : > { %230 = vst [vmem:[%s174_s6 + $0x20] sm:$0xff] (%p721_p3), %v229_v6  ;;  %232 = vst [vmem:[%s174_s6 + $0x28] sm:$0xff] (%p721_p3), %v231_v7  ;;  %v235_v9 = vld [vmem:[%s179_s5 + $0xa8] sm:$0xff] (%p721_p3) }
  0x20   : > { %234 = vst [vmem:[%s174_s6 + $0x30] sm:$0xff] %v233_v8  ;;  %236 = vst [vmem:[%s174_s6 + $0x38] sm:$0xff] %v235_v9 }
  0x21 PF: > { %p563_p8 = scmp.ge.s32.totalorder %s672_s13, 1  ;;  %p241_p9 = scmp.lt.s32.totalorder %s672_s13, 4 }
  0x23   : > { %p242_p10 = pnand %p563_p8, %p241_p9 }
  0x24   : > { %s248_s7 = sand.u32 (!%p242_p10), 1, %s656_s9  }
  0x25   : > { %245 = sbr.rel (%p242_p10) target bundleno = 69 (0x45), region = 96  ;;  %s753_s8 = sshll.u32 (!%p242_p10), %s248_s7, 4 }
  0x26   : > { %s565_s15 = sshll.u32 (!%p242_p10), %s248_s7, 6  ;;  %s756_s16 = scalar_lea.vmem (!%p242_p10), [#allocation2], %s753_s8 }
  0x27   : > { %v567_v10 = vld [vmem:[%s756_s16] ss:$0 sm:$0xff] (!%p242_p10)  ;;  %s759_s17 = scalar_lea.vmem (!%p242_p10), [#allocation3], %s565_s15  ;;  %v570_v12 = vld [vmem:[%s756_s16 + $0x1] ss:$0 sm:$0xff] (!%p242_p10)  ;;  %s278_s9 = scalar_lea.vmem (!%p242_p10), [#allocation4], %s753_s8 }
  0x28   : > { %v282_v11 = vld [vmem:[%s759_s17] sm:$0xff] (!%p242_p10)  ;;  %v569_v14 = vld [vmem:[%s759_s17 + $0x8] sm:$0xff] (!%p242_p10)  ;;  %v572_v16 = vld [vmem:[%s759_s17 + $0x10] sm:$0xff] (!%p242_p10) }
  0x29   : > { %v291_v13 = vmul.f32 (!%p242_p10), %v567_v10, %v282_v11  ;;  %v573_v15 = vld [vmem:[%s756_s16 + $0x2] ss:$0 sm:$0xff] (!%p242_p10)  ;;  %v307_v17 = vmul.f32 (!%p242_p10), %v570_v12, %v569_v14  ;;  %v576_v19 = vld [vmem:[%s756_s16 + $0x3] ss:$0 sm:$0xff] (!%p242_p10)  ;;  %v575_v20 = vld [vmem:[%s759_s17 + $0x18] sm:$0xff] (!%p242_p10) }
  0x2a   : > { %v323_v18 = vmul.f32 (!%p242_p10), %v573_v15, %v572_v16  ;;  %v579_v21 = vld [vmem:[%s756_s16 + $0x4] ss:$0 sm:$0xff] (!%p242_p10)  ;;  %v339_v24 = vmul.f32 (!%p242_p10), %v576_v19, %v575_v20  ;;  %v582_v25 = vld [vmem:[%s756_s16 + $0x5] ss:$0 sm:$0xff] (!%p242_p10)  ;;  %v581_v26 = vld [vmem:[%s759_s17 + $0x28] sm:$0xff] (!%p242_p10) }
  0x2b   : > { %v578_v22 = vld [vmem:[%s759_s17 + $0x20] sm:$0xff] (!%p242_p10)  ;;  %v309_v23 = vadd.f32 (!%p242_p10), %v307_v17, %v291_v13  ;;  %v568_v27 = vld [vmem:[%s756_s16 + $0x8] ss:$0 sm:$0xff] (!%p242_p10)  ;;  %v571_v28 = vld [vmem:[%s756_s16 + $0x9] ss:$0 sm:$0xff] (!%p242_p10)  ;;  %v371_v40 = vmul.f32 (!%p242_p10), %v582_v25, %v581_v26 }
  0x2c   : > { %v355_v30 = vmul.f32 %v579_v21, %v578_v22  ;;  %v292_v31 = vmul.f32 %v568_v27, %v282_v11  ;;  %v308_v32 = vmul.f32 %v571_v28, %v569_v14  ;;  %v574_v33 = vld [vmem:[%s756_s16 + $0xa] ss:$0 sm:$0xff]  ;;  %v577_v34 = vld [vmem:[%s756_s16 + $0xb] ss:$0 sm:$0xff]  ;;  %v585_v35 = vld [vmem:[%s756_s16 + $0x6] ss:$0 sm:$0xff] }
  0x2d   : > { %v325_v29 = vadd.f32 %v323_v18, %v309_v23  ;;  %v584_v36 = vld [vmem:[%s759_s17 + $0x30] sm:$0xff]  ;;  %v324_v37 = vmul.f32 %v574_v33, %v572_v16  ;;  %v580_v38 = vld [vmem:[%s756_s16 + $0xc] ss:$0 sm:$0xff]  ;;  %v340_v42 = vmul.f32 %v577_v34, %v575_v20  ;;  %v583_v45 = vld [vmem:[%s756_s16 + $0xd] ss:$0 sm:$0xff]  ;;  %s591_s18 = sshll.u32 (%p728_p6), %s664_s11, 3 }
  0x2e   : > { %v310_v41 = vadd.f32 %v308_v32, %v292_v31  ;;  %v588_v43 = vld [vmem:[%s756_s16 + $0x7] ss:$0 sm:$0xff]  ;;  %v587_v44 = vld [vmem:[%s759_s17 + $0x38] sm:$0xff]  ;;  %v387_v47 = vmul.f32 %v585_v35, %v584_v36  ;;  %v356_v49 = vmul.f32 %v580_v38, %v578_v22  ;;  %v372_v54 = vmul.f32 %v583_v45, %v581_v26  ;;  %s431_s23 = scalar_lea.vmem (%p728_p6), %s808_s2, %s591_s18 }
  0x2f   : > { %v341_v39 = vadd.f32 %v339_v24, %v325_v29  ;;  %v586_v50 = vld [vmem:[%s756_s16 + $0xe] ss:$0 sm:$0xff]  ;;  %v403_v52 = vmul.f32 %v588_v43, %v587_v44  ;;  %v589_v55 = vld [vmem:[%s756_s16 + $0xf] ss:$0 sm:$0xff] }
  0x30   : > { %v326_v48 = vadd.f32 %v324_v37, %v310_v41  ;;  %v388_v58 = vmul.f32 %v586_v50, %v584_v36  ;;  %v404_v61 = vmul.f32 %v589_v55, %v587_v44 }
  0x31   : > { %v357_v46 = vadd.f32 %v355_v30, %v341_v39 }
  0x32   : > { %v342_v53 = vadd.f32 %v340_v42, %v326_v48 }
  0x33   : > { %v373_v51 = vadd.f32 %v371_v40, %v357_v46 }
  0x34   : > { %v358_v57 = vadd.f32 %v356_v49, %v342_v53 }
  0x35   : > { %v389_v56 = vadd.f32 %v387_v47, %v373_v51 }
  0x36   : > { %v374_v60 = vadd.f32 %v372_v54, %v358_v57  ;;  %429 = sbr.rel (!%p728_p6) target bundleno = 69 (0x45), region = 116 }
  0x37   : > { %v405_v59 = vadd.f32 %v403_v52, %v389_v56 }
  0x38   : > { %v390_v62 = vadd.f32 %v388_v58, %v374_v60 }
  0x39   : > { %411 = vst [vmem:[%s278_s9] sm:$0xff] %v405_v59 }
  0x3a   : > { %v406_v63 = vadd.f32 %v404_v61, %v390_v62 }
  0x3c   : > { %412 = vst [vmem:[%s278_s9 + $0x8] sm:$0xff] %v406_v63 }
  0x40   : > { %v461_v0 = vld [vmem:[%s278_s9] sm:$0xff] }
  0x41   : > { %462 = vst [vmem:[%s431_s23] sm:$0xff] %v461_v0 }
  0x43   : > { %v463_v1 = vld [vmem:[%s278_s9 + $0x8] sm:$0xff] }
  0x44   : > { %464 = vst [vmem:[%s431_s23 + $0x18] sm:$0xff] %v463_v1 }
  0x45 PF: > { %s12_s13 = sadd.s32 1, %s672_s13   ;;  %s811_s9 = smov %s660_s10 }
  0x46   : > { %p9_p11 = scmp.ge.s32.totalorder %s12_s13, 5   ;;  %s812_s10 = smov %s733_s20 }
  0x47   : > { %s813_s11 = smov %s668_s12  ;;  %s814_s12 = smov %s816_s14 }
  0x48   :  { %11 = sbr.rel (!%p9_p11) target bundleno = 3 (0x3), region = 200 }

</bundles_post_ra>
